<compile_context>
chip_gen: v5e
topology: v5e:2x2
jax: 0.10.0
libtpu: 0.0.40
codegen_flags: <defaults>
</compile_context>

<pallas_src>
import jax
import jax.numpy as jnp
from jax.experimental import pallas as pl
from jax.experimental.pallas import tpu as pltpu


def _round_up(n, m):
    return ((n + m - 1) // m) * m


def _glu1d_kernel(x_ref, w_ref, b_ref, o_ref):
    """One (batch, time-tile) step.

    x_ref: (1, C_in, TT)         input tile (compute dtype)
    w_ref: (2*C_out_p, C_in)     fused [W; W_gate] (compute dtype), VMEM-resident
    b_ref: (2*C_out_p, 1)        fused [b; b_gate] in f32, VMEM-resident
    o_ref: (1, C_out_p, TT)      output tile (original dtype)
    """
    c_half = o_ref.shape[1]                        # sublane-aligned C_out

    x = x_ref[0]                                   # (C_in, TT)
    # Single fused MXU pass, f32 accumulation.
    y = jnp.dot(w_ref[...], x, preferred_element_type=jnp.float32)  # (2*c_half, TT)
    y = y + b_ref[...]                             # lane-broadcast bias add (f32)

    lin = y[:c_half, :]                            # free view (c_half % 8 == 0)
    gate = y[c_half:, :]
    # sigmoid(g) == 0.5 * (tanh(0.5 * g) + 1): one EUP transcendental instead of
    # exp + divide.
    sig = 0.5 * (jnp.tanh(0.5 * gate) + 1.0)
    o_ref[0] = (lin * sig).astype(o_ref.dtype)


def glu1d_forward(x, w, b, wg, bg, *, tile_t=1024, compute_dtype=None,
                  stream_buffers=2):
    """GLU1d forward: out = (W @ x + b) * sigmoid(Wg @ x + bg), per time step.

    Args:
      x:  (B, C_in, T)    input, NCT layout (same as PyTorch Conv1d input)
      w:  (C_out, C_in)   1x1 conv weight for `map`      (= torch weight[:, :, 0])
      b:  (C_out,)        bias for `map`
      wg: (C_out, C_in)   1x1 conv weight for `map_gate` (= torch weight[:, :, 0])
      bg: (C_out,)        bias for `map_gate`
      tile_t:        requested time-axis tile (rounded to a multiple of 128,
                     capped by the VMEM budget).
      compute_dtype: optional dtype (e.g. jnp.bfloat16) to run the matmul in;
                     activations/weights are cast, accumulation and the gating
                     epilogue stay f32, output keeps the original dtype.
      stream_buffers: pipeline depth for the streamed x tiles (default 2).
    Returns:
      (B, C_out, T) in the original dtype of x.
    """
    B, C_in, T = x.shape
    C_out = w.shape[0]

    orig_dtype = x.dtype
    if compute_dtype is not None and jnp.dtype(compute_dtype) != jnp.dtype(x.dtype):
        x = x.astype(compute_dtype)
    cdt = x.dtype
    itemsize = int(jnp.dtype(cdt).itemsize)
    out_itemsize = int(jnp.dtype(orig_dtype).itemsize)

    # Sublane alignment for the f32-intermediate split / output block.
    sub = 8 * max(1, 4 // itemsize)          # f32 -> 8, bf16 -> 16, int8 -> 32
    C_out_p = _round_up(C_out, sub)
    pad_r = C_out_p - C_out

    # Fused weight (2*C_out_p, C_in) = [W ; 0 ; W_gate ; 0]; fused bias likewise.
    w_f = jnp.concatenate(
        [jnp.pad(w.astype(cdt), ((0, pad_r), (0, 0))),
         jnp.pad(wg.astype(cdt), ((0, pad_r), (0, 0)))], axis=0)
    b_f = jnp.concatenate(
        [jnp.pad(b.astype(jnp.float32), (0, pad_r)),
         jnp.pad(bg.astype(jnp.float32), (0, pad_r))], axis=0
    ).reshape(2 * C_out_p, 1)

    # --- VMEM budget (bytes) as a function of the time tile tt ----------------
    #   x tiles   : stream_buffers * C_in    * tt * itemsize
    #   out tiles : 2              * C_out_p * tt * out_itemsize
    #   weights   : 2 * C_out_p * C_in * itemsize          (single-buffered)
    #   bias      : 2 * C_out_p * 4
    #   y (f32)   : 2 * C_out_p * tt * 4                   (in-kernel intermediate)
    fixed = 2 * C_out_p * C_in * itemsize + 2 * C_out_p * 4
    per_t = (stream_buffers * C_in * itemsize
             + 2 * C_out_p * out_itemsize
             + 2 * C_out_p * 4)
    VMEM_TARGET = 44 << 20                   # comfortably under v7x's 64 MiB VMEM
    tt_cap = max(128, ((max(VMEM_TARGET - fixed, 0) // per_t) // 128) * 128)

    # Sub-32-bit dtypes want >= 256 lanes so each C_in row DMA is >= 512 B.
    min_tt = 256 if itemsize < 4 else 128

    if T <= 128:
        # Full-axis block (exempt from the 128-lane alignment rule). A further
        # megacore split is impossible below 128 lanes.
        tt = T
    else:
        tt = max(min_tt, (max(tile_t, 128) // 128) * 128)
        tt = min(tt, _round_up(T, 128), tt_cap)
        tt = max(tt, 128)
        # v7x megacore: guarantee >= 2 grid steps when B == 1 so both TCs work.
        if B == 1 and pl.cdiv(T, tt) < 2:
            tt = min(tt, max(min_tt, _round_up(pl.cdiv(T, 2), 128)))

    grid = (B, pl.cdiv(T, tt))

    need = fixed + per_t * tt
    vmem_limit_bytes = int(min(64 << 20, max(need + (4 << 20), 32 << 20)))

    x_spec_kwargs = {}
    if stream_buffers != 2:
        x_spec_kwargs["pipeline_mode"] = pl.Buffered(stream_buffers)

    in_specs = [
        # x tile: (1, C_in, TT), streamed / multi-buffered.
        pl.BlockSpec((1, C_in, tt), lambda bi, ti: (bi, 0, ti), **x_spec_kwargs),
        # fused weights & bias: constant index_map, VMEM-resident, single buffer.
        pl.BlockSpec((2 * C_out_p, C_in), lambda bi, ti: (0, 0),
                     pipeline_mode=pl.Buffered(1)),
        pl.BlockSpec((2 * C_out_p, 1), lambda bi, ti: (0, 0),
                     pipeline_mode=pl.Buffered(1)),
    ]
    # Output block is (1, C_out_p, tt); writes past C_out / T are masked by the
    # Pallas boundary handling of non-dividing blocks.
    out_spec = pl.BlockSpec((1, C_out_p, tt), lambda bi, ti: (bi, 0, ti))

    out = pl.pallas_call(
        _glu1d_kernel,
        out_shape=jax.ShapeDtypeStruct((B, C_out, T), orig_dtype),
        grid_spec=pltpu.PrefetchScalarGridSpec(
            num_scalar_prefetch=0,
            grid=grid,
            in_specs=in_specs,
            out_specs=out_spec,
        ),
        compiler_params=pltpu.CompilerParams(
            dimension_semantics=("parallel", "parallel"),
            vmem_limit_bytes=vmem_limit_bytes,
        ),
        cost_estimate=pl.CostEstimate(
            flops=4 * B * T * C_in * C_out,
            transcendentals=B * T * C_out,
            bytes_accessed=(itemsize * B * T * C_in
                            + out_itemsize * B * T * C_out
                            + itemsize * 2 * C_out_p * C_in
                            + 4 * 2 * C_out_p),
        ),
    )(x, w_f, b_f)

    return out


if __name__ == "__main__":
    key = jax.random.PRNGKey(0)

    def ref_glu1d(x, w, b, wg, bg):
        lin = jnp.einsum("bct,oc->bot", x, w) + b[None, :, None]
        gate = jnp.einsum("bct,oc->bot", x, wg) + bg[None, :, None]
        return lin * jax.nn.sigmoid(gate)

    # Case 1: small shapes, single (full-T) time tile per batch element.
    B, C_in, C_out, T = 2, 4, 8, 16
    k = jax.random.split(key, 6)
    x = jax.random.normal(k[0], (B, C_in, T), dtype=jnp.float32)
    w = jax.random.normal(k[1], (C_out, C_in), dtype=jnp.float32) * 0.1
    b = jax.random.normal(k[2], (C_out,), dtype=jnp.float32) * 0.1
    wg = jax.random.normal(k[3], (C_out, C_in), dtype=jnp.float32) * 0.1
    bg = jax.random.normal(k[4], (C_out,), dtype=jnp.float32) * 0.1

    out = glu1d_forward(x, w, b, wg, bg)
    jax.block_until_ready(out)
    ref = ref_glu1d(x, w, b, wg, bg)
    assert out.shape == (B, C_out, T)
    assert jnp.allclose(out, ref, atol=1e-5, rtol=1e-5)

    # Case 2: ragged T (not a multiple of 128), multi-step pipeline, no host-side
    # padding of x / slicing of out (boundary block masked by Pallas).
    B2, C_in2, C_out2, T2 = 2, 4, 8, 300
    k2 = jax.random.split(k[5], 6)
    x2 = jax.random.normal(k2[0], (B2, C_in2, T2), dtype=jnp.float32)
    w2 = jax.random.normal(k2[1], (C_out2, C_in2), dtype=jnp.float32) * 0.1
    b2 = jax.random.normal(k2[2], (C_out2,), dtype=jnp.float32) * 0.1
    wg2 = jax.random.normal(k2[3], (C_out2, C_in2), dtype=jnp.float32) * 0.1
    bg2 = jax.random.normal(k2[4], (C_out2,), dtype=jnp.float32) * 0.1

    out2 = glu1d_forward(x2, w2, b2, wg2, bg2, tile_t=256)
    jax.block_until_ready(out2)
    ref2 = ref_glu1d(x2, w2, b2, wg2, bg2)
    assert out2.shape == (B2, C_out2, T2)
    assert jnp.allclose(out2, ref2, atol=1e-5, rtol=1e-5)

    # Case 3: B == 1 (time axis split for v7x megacore), C_out not a multiple of
    # 8 (sublane-padded fused weight / masked channel writes), ragged T.
    B3, C_in3, C_out3, T3 = 1, 4, 6, 200
    k3 = jax.random.split(k2[5], 5)
    x3 = jax.random.normal(k3[0], (B3, C_in3, T3), dtype=jnp.float32)
    w3 = jax.random.normal(k3[1], (C_out3, C_in3), dtype=jnp.float32) * 0.1
    b3 = jax.random.normal(k3[2], (C_out3,), dtype=jnp.float32) * 0.1
    wg3 = jax.random.normal(k3[3], (C_out3, C_in3), dtype=jnp.float32) * 0.1
    bg3 = jax.random.normal(k3[4], (C_out3,), dtype=jnp.float32) * 0.1

    out3 = glu1d_forward(x3, w3, b3, wg3, bg3)
    jax.block_until_ready(out3)
    ref3 = ref_glu1d(x3, w3, b3, wg3, bg3)
    assert out3.shape == (B3, C_out3, T3)
    assert jnp.allclose(out3, ref3, atol=1e-5, rtol=1e-5)

    print("KERNEL_OK")
</pallas_src>

<mosaic_0001>
module attributes {stable_mosaic.version = 11 : i64} {
  func.func @_glu1d_kernel(%arg0: i32, %arg1: i32, %arg2: memref<1x4x16xf32, #tpu.memory_space<vmem>>, %arg3: memref<16x4xf32, #tpu.memory_space<vmem>>, %arg4: memref<16x1xf32, #tpu.memory_space<vmem>>, %arg5: memref<1x8x16xf32, #tpu.memory_space<vmem>>) attributes {dimension_semantics = [#tpu.dimension_semantics<parallel>, #tpu.dimension_semantics<parallel>], iteration_bounds = array<i64: 2, 1>, scalar_prefetch = 0 : i64, scratch_operands = 0 : i64, tpu.core_type = #tpu.core_type<tc>, window_params = [{transform_indices = @transform_0, window_bounds = array<i64: 1, 4, 16>}, {pipeline_mode = #tpu.pipeline_mode<synchronous>, transform_indices = @transform_1, window_bounds = array<i64: 16, 4>}, {pipeline_mode = #tpu.pipeline_mode<synchronous>, transform_indices = @transform_2, window_bounds = array<i64: 16, 1>}, {transform_indices = @transform_3, window_bounds = array<i64: 1, 8, 16>}]} {
    %c0 = arith.constant 0 : index
    %c0_0 = arith.constant 0 : index
    %c0_1 = arith.constant 0 : index
    %0 = vector.load %arg2[%c0, %c0_0, %c0_1] : memref<1x4x16xf32, #tpu.memory_space<vmem>>, vector<1x4x16xf32>
    %1 = vector.shape_cast %0 : vector<1x4x16xf32> to vector<4x16xf32>
    %c0_2 = arith.constant 0 : index
    %c0_3 = arith.constant 0 : index
    %2 = vector.load %arg3[%c0_2, %c0_3] : memref<16x4xf32, #tpu.memory_space<vmem>>, vector<16x4xf32>
    %cst = arith.constant dense<0.000000e+00> : vector<16x16xf32>
    %3 = tpu.matmul %2, %1, %cst {dimension_numbers = #tpu.dot_dimension_numbers<[1], [0], [0], [1], [0, 0, 1, 1], [], []>} : vector<16x4xf32>, vector<4x16xf32>, vector<16x16xf32> -> vector<16x16xf32>
    %c0_4 = arith.constant 0 : index
    %c0_5 = arith.constant 0 : index
    %4 = vector.load %arg4[%c0_4, %c0_5] : memref<16x1xf32, #tpu.memory_space<vmem>>, vector<16x1xf32>
    %5 = vector.broadcast %4 : vector<16x1xf32> to vector<16x16xf32>
    %6 = arith.addf %3, %5 : vector<16x16xf32>
    %7 = vector.extract_strided_slice %6 {offsets = [0, 0], sizes = [8, 16], strides = [1, 1]} : vector<16x16xf32> to vector<8x16xf32>
    %8 = vector.extract_strided_slice %6 {offsets = [8, 0], sizes = [8, 16], strides = [1, 1]} : vector<16x16xf32> to vector<8x16xf32>
    %cst_6 = arith.constant 5.000000e-01 : f32
    %9 = vector.broadcast %cst_6 : f32 to vector<8x16xf32>
    %10 = arith.mulf %9, %8 : vector<8x16xf32>
    %11 = math.tanh %10 : vector<8x16xf32>
    %cst_7 = arith.constant 1.000000e+00 : f32
    %12 = vector.broadcast %cst_7 : f32 to vector<8x16xf32>
    %13 = arith.addf %11, %12 : vector<8x16xf32>
    %cst_8 = arith.constant 5.000000e-01 : f32
    %14 = vector.broadcast %cst_8 : f32 to vector<8x16xf32>
    %15 = arith.mulf %14, %13 : vector<8x16xf32>
    %16 = arith.mulf %7, %15 : vector<8x16xf32>
    %c0_9 = arith.constant 0 : index
    %c0_10 = arith.constant 0 : index
    %c0_11 = arith.constant 0 : index
    %17 = vector.load %arg5[%c0_9, %c0_10, %c0_11] : memref<1x8x16xf32, #tpu.memory_space<vmem>>, vector<1x8x16xf32>
    %18 = vector.shape_cast %17 : vector<1x8x16xf32> to vector<8x16xf32>
    %19 = vector.shape_cast %16 : vector<8x16xf32> to vector<1x8x16xf32>
    tpu.vector_store %arg5[%c0_9, %c0_10, %c0_11], %19 {strides = array<i32>} : memref<1x8x16xf32, #tpu.memory_space<vmem>>, vector<1x8x16xf32>,
    return
  }
  func.func @transform_0(%arg0: i32, %arg1: i32) -> (i32, i32, i32) {
    %c0_i32 = arith.constant 0 : i32
    %c0_i32_0 = arith.constant 0 : i32
    return %arg0, %c0_i32, %arg1 : i32, i32, i32
  }
  func.func @transform_1(%arg0: i32, %arg1: i32) -> (i32, i32) {
    %c0_i32 = arith.constant 0 : i32
    %c0_i32_0 = arith.constant 0 : i32
    %c0_i32_1 = arith.constant 0 : i32
    return %c0_i32, %c0_i32_0 : i32, i32
  }
  func.func @transform_2(%arg0: i32, %arg1: i32) -> (i32, i32) {
    %c0_i32 = arith.constant 0 : i32
    %c0_i32_0 = arith.constant 0 : i32
    %c0_i32_1 = arith.constant 0 : i32
    return %c0_i32, %c0_i32_0 : i32, i32
  }
  func.func @transform_3(%arg0: i32, %arg1: i32) -> (i32, i32, i32) {
    %c0_i32 = arith.constant 0 : i32
    %c0_i32_0 = arith.constant 0 : i32
    return %arg0, %c0_i32, %arg1 : i32, i32, i32
  }
}

</mosaic_0001>

<bundles_post_ra>
// kernel: tpu_custom_call.1
= control target key start
LH: loop header
LB: loop body
LE: loop exit
PB: predicated region body
PF: predicated region fallthrough
CT: control target
= control target key end

     0   :  { %8 = vsyncpa [#allocation3], 0  ;;  %s619_s0 = inlined_call_operand.vmem [shape: f32[2,4,16], index: 0, kind: input, shape index: {}]   ;;  %s620_s1 = inlined_call_operand.vmem [shape: f32[16,4], index: 1, kind: input, shape index: {}]   ;;  %s621_s2 = inlined_call_operand.vmem [shape: f32[16,1], index: 2, kind: input, shape index: {}]   ;;  %s622_s3 = inlined_call_operand.hbm [shape: f32[2,8,16], index: 3, kind: output, shape index: {}]  }
   0x1   :  { %10 = vsyncpa [#allocation3 + $0x1], 0  ;;  %s510_s12 = smov 0   ;;  %s512_s13 = smov 0  }
   0x2   :  { %s514_s14 = smov 0   ;;  %s516_s15 = smov 0  }
   0x3   :  { %s518_s16 = smov 0   ;;  %s520_s17 = smov 0  }
   0x4 LB: > { %s335_s18 = sadd.s32 4294967295, %s487_s17   ;;  %s336_s19 = sadd.s32 4294967294, %s487_s17   ;;  %s487_s17 = sphi %s520_s17, %s16_s17   ;;  %s483_s16 = sphi %s518_s16, %s629_s16   ;;  %s479_s15 = sphi %s516_s15, %s628_s15   ;;  %s475_s14 = sphi %s514_s14, %s627_s14   ;;  %s471_s13 = sphi %s512_s13, %s626_s13   ;;  %s467_s12 = sphi %s510_s12, %s625_s12  }
   0x5   : > { %s28_s20 = sadd.s32 1, %s483_s16  ;;  %s107_s21 = sadd.s32 1, %s475_s14 }
   0x6   : > { %p30_p0 = scmp.ge.s32.totalorder %s28_s20, 2  ;;  %p117_p1 = scmp.ne.s32.totalorder %s475_s14, %s471_s13 }
   0x7   : > { %p118_p2 = scmp.eq.s32.totalorder %s335_s18, 1  ;;  %p123_p3 = scmp.ne.s32.totalorder %s471_s13, %s467_s12 }
   0x8   : > { %s631_s20 = smov (%p30_p0, %s28_s20), 0  ;;  %p124_p5 = scmp.eq.s32.totalorder %s336_s19, 1 }
   0x9   : > { %p550_p4 = por %p118_p2, %p117_p1  ;;  %s102_s23 = ssub.s32 %s483_s16, %s631_s20 }
   0xa   : > { %p339_p6 = scmp.ge.s32.totalorder %s487_s17, 1  ;;  %p105_p7 = scmp.eq.s32.totalorder %s102_s23, 0 }
   0xb   : > { %p557_p8 = por %p124_p5, %p123_p3  ;;  %p158_p9 = scmp.lt.s32.totalorder %s487_s17, 3 }
   0xc   : > { %s563_s25 = scalar_select %p105_p7, %s475_s14, %s107_s21  }
   0xd   : > { %p159_p10 = pnand %p339_p6, %p158_p9 }
   0xe   : > { %p184_p11 = scmp.lt.s32.totalorder (!%p159_p10), %s479_s15, 1  ;;  %s181_s18 = sand.u32 (!%p159_p10), 1, %s471_s13  }
   0xf   : > { %162 = sbr.rel (%p159_p10) target bundleno = 172 (0xac), region = 32  ;;  %s340_s19 = sshll.u32 (!%p159_p10), %s181_s18, 3 }
  0x10   : > { %s346_s21 = sshll.u32 (!%p159_p10), %s479_s15, 3  ;;  %s429_s8 = scalar_lea.hbm (!%p159_p10), %s622_s3, 16 }
  0x11   : > { %s259_s27 = scalar_lea.hbm (!%p159_p10), %s622_s3, %s346_s21 }
  0x12   : > { %s263_s30 = sshll.u32 (!%p159_p10), %s259_s27, 4  ;;  %s264_s30 = int_to_ptr.hbm [resolvable:$true] %s263_s30 }
  0x13   : > { %s423_s4 = sshra.s32 (!%p159_p10), %s264_s30, 4  ;;  %s424_s4 = int_to_ptr.hbm [resolvable:$true] %s423_s4 }
  0x14   : > { %v489_v0 = vmov 0   ;;  %v195_v1 = vld [vmem:[%s621_s2 + $0x8] sm:$0xff]  ;;  %s185_s28 = scalar_select %p184_p11, %s479_s15, 1  ;;  %vm213_vm0 = vcmask 1043456   ;;  %v192_v2 = vld [vmem:[%s620_s1] sm:$0xff]  ;;  %vm206_vm1 = vcmask 31744  }
  0x15   : > { %406 = vset.pattern.permute.xlu0 %v489_v0  ;;  %v193_v3 = vld [vmem:[%s620_s1 + $0x8] sm:$0xff]  ;;  %v194_v5 = vld [vmem:[%s621_s2] sm:$0xff]  ;;  %vm245_vm2 = vcmask 130048   ;;  %s248_s15 = scalar_lea.sflag [#allocation3], %s181_s18  ;;  %p430_p1 = scmp.lt.s32.totalorder %s424_s4, %s622_s3 }
  0x16   : > { %203 = vperm.xlu0 %406, %v195_v1   ;;  %s341_s29 = sshll.u32 %s185_s28, 2  ;;  %s183_s28 = scalar_lea.vmem [#allocation2], %s340_s19 }
  0x17   : > { %s190_s5 = scalar_lea.vmem %s619_s0, %s341_s29  ;;  %s261_s29 = sshll.u32 %s183_s28, 4  ;;  %s262_s29 = int_to_ptr.vmem [resolvable:$true] %s261_s29 }
  0x18   : > { %v191_v4 = vld [vmem:[%s190_s5] sm:$0xf]  ;;  %s425_s5 = scalar_lea.hbm %s424_s4, 8 }
  0x19   : > { %342 = vmatpush.msk.msra.mxu0 %vm213_vm0, %v191_v4  ;;  %349 = vmatpush.msk.msra.mxu1 %vm213_vm0, %v191_v4  ;;  %p426_p12 = scmp.ne.s32.totalorder %s424_s4, %s425_s5  ;;  %p431_p2 = scmp.lt.s32.totalorder %s429_s8, %s425_s5 }
  0x1a   : > { %343 = vmatmul.msk.f32.vlgmr.msra.gmra.mxu0 %vm206_vm1, %v192_v2  ;;  %344 = vmatmul.msk.f32.vlgmr.msra.gmra.mxu1 %vm206_vm1, %v193_v3 }
  0x1b   : > { %p427_p13 = pnand %p426_p12, %p550_p4  ;;  %p432_p3 = por %p431_p2, %p430_p1 }
  0x1d   : > { %p428_p0 = pneg %p427_p13 }
  0x1e   : > { %198 = vperm.xlu0 %406, %v194_v5  }
  0x1f   : > { %p433_p5 = pnand %p432_p3, %p428_p0 }
  0x88   : > { %v204_v6 = vpop.permute.xlu0 %203 }
  0x90   : > { %v199_v11 = vpop.permute.xlu0 %198 }
  0x97   : > { %v237_v7 = vpop.f32.mrf.mxu1  ;;  %v234_v12 = vpop.f32.mrf.mxu0 }
  0x98   : > { %v238_v8 = vadd.f32 %v237_v7, %v204_v6  ;;  %v235_v14 = vadd.f32 %v234_v12, %v199_v11 }
  0x9a   : > { %v240_v9 = vmul.f32 0.5, %v238_v8 }
  0x9c   : > { %407 = vtanh.f32 %v240_v9 }
  0xa2   : > { %v408_v10 = vpop.eup %407 }
  0xa3   : > { %v242_v13 = vadd.f32 1.0, %v408_v10 }
  0xa5   : > { %v243_v15 = vmul.f32 0.5, %v242_v13 }
  0xa7   : > { %v244_v16 = vmul.f32 %v243_v15, %v235_v14 }
  0xa9   : > { %246 = vst.msk [vmem:[%s183_s28] sm:$0xff] %vm245_vm2, %v244_v16 }
  0xaa   : > { %436 = shalt.err (!%p433_p5)
}
  0xab   : > { %350 = dma.vmem_to_hbm [thread:$0]  (%p550_p4), %s262_s29, 128, %s264_s30, %s248_s15  }
  0xac PF: > { %p356_p6 = scmp.ge.s32.totalorder %s487_s17, 2  ;;  %s275_s11 = sand.u32 1, %s467_s12  }
  0xad   : > { %s276_s18 = scalar_lea.sflag [#allocation3], %s275_s11 }
  0xae   : > { %p353_p7 = pnand %p356_p6, %p557_p8 }
  0xb0   : > { %p354_p9 = pneg %p353_p7 }
  0xb2   : > { %462 = dma.done.wait (%p354_p9), %s276_s18, 128  }
  0xb3   : > { %464 = vsyncadd (%p354_p9), %s276_s18, 4294967168  ;;  %s16_s17 = sadd.s32 1, %s487_s17   ;;  %s625_s12 = smov %s471_s13 }
  0xb4   : > { %p13_p10 = scmp.ge.s32.totalorder %s16_s17, 4   ;;  %s626_s13 = smov %s475_s14 }
  0xb5   : > { %s627_s14 = smov %s563_s25  ;;  %s628_s15 = smov %s483_s16 }
  0xb6   : > { %s629_s16 = smov %s631_s20  ;;  %15 = sbr.rel (!%p13_p10) target bundleno = 4 (0x4), region = 67 }
  0xbb   :  { %282 = vsyncpa [#allocation3], 1 }
  0xbc   :  { %284 = vsyncpa [#allocation3 + $0x1], 1 }

</bundles_post_ra>
